<compile_context>
chip_gen: v7x
topology: tpu7x:2x2x1
jax: 0.10.0
libtpu: 0.0.40
codegen_flags: <defaults>
</compile_context>

<pallas_src>
import jax
import jax.numpy as jnp
from jax.experimental import pallas as pl
from jax.experimental.pallas import tpu as pltpu


def _round_up(a, b):
    return (a + b - 1) // b * b


def _pick_hidden_tile(hidden, cap=512):
    """Largest 128-multiple tile <= cap that divides hidden, else whole hidden."""
    for th in (cap, 384, 256, 128):
        if th <= hidden and hidden % th == 0:
            return th
    return hidden  # block == full dim is always legal


def _ffn_kernel(x_ref, w13_ref, w2_ref, o_ref, acc_ref):
    # x_ref  : (tm, dim)    bf16
    # w13_ref: (dim, 2*th)  bf16, columns = [w1_tile | w3_tile]
    # w2_ref : (th, dim)    bf16
    # o_ref  : (tm, dim)    out dtype
    # acc_ref: (tm, dim)    f32 accumulator across hidden tiles
    j = pl.program_id(1)
    th = w2_ref.shape[0]

    @pl.when(j == 0)
    def _():
        acc_ref[...] = jnp.zeros_like(acc_ref)

    # First GEMM: one wide dot produces both the w1 and w3 projections.
    h13 = jnp.dot(x_ref[...], w13_ref[...],
                  preferred_element_type=jnp.float32)          # (tm, 2*th) f32
    h1 = h13[:, :th]
    h3 = h13[:, th:]
    # SwiGLU gate in f32 (VPU/EUP).
    h = (h1 * jax.nn.sigmoid(h1)) * h3

    # Second GEMM: accumulate this hidden tile's contribution in f32.
    acc_ref[...] += jnp.dot(h.astype(w2_ref.dtype), w2_ref[...],
                            preferred_element_type=jnp.float32)

    # Write the output exactly once, lane-dense, at the last hidden step.
    @pl.when(j == pl.num_programs(1) - 1)
    def _():
        o_ref[...] = acc_ref[...].astype(o_ref.dtype)


def feed_forward(x, w1, w3, w2, *, tm_target=256, th_cap=512):
    """x: (B, S, dim). w1, w3: (dim, hidden). w2: (hidden, dim)."""
    B, S, dim = x.shape
    hidden = w1.shape[1]
    M = B * S
    out_dtype = x.dtype

    # Row tiling: large MXU-filling tile, clamped for tiny problems; pad rows.
    tm = min(tm_target, _round_up(M, 8))
    M_pad = _round_up(M, tm)

    # Hidden tiling (reduction axis of the second GEMM).
    th = _pick_hidden_tile(hidden, th_cap)
    nh = hidden // th

    x2d = x.reshape(M, dim)
    if M_pad != M:
        x2d = jnp.pad(x2d, ((0, M_pad - M), (0, 0)))  # zero rows -> zero output rows

    # Fuse w1/w3 so each hidden tile's columns are contiguous: [... w1_j | w3_j ...].
    w13 = jnp.concatenate(
        [w1.reshape(dim, nh, th), w3.reshape(dim, nh, th)], axis=2
    ).reshape(dim, 2 * hidden)

    # bf16 operands for the MXU (f32 accumulation inside the kernel).
    xb = x2d.astype(jnp.bfloat16)
    w13b = w13.astype(jnp.bfloat16)
    w2b = w2.astype(jnp.bfloat16)

    out = pl.pallas_call(
        _ffn_kernel,
        out_shape=jax.ShapeDtypeStruct((M_pad, dim), out_dtype),
        grid_spec=pltpu.PrefetchScalarGridSpec(
            num_scalar_prefetch=0,
            grid=(M_pad // tm, nh),                              # reduction axis last
            in_specs=[
                pl.BlockSpec((tm, dim), lambda i, j: (i, 0)),      # x row tile
                pl.BlockSpec((dim, 2 * th), lambda i, j: (0, j)),  # fused [w1|w3] tile
                pl.BlockSpec((th, dim), lambda i, j: (j, 0)),      # w2 tile
            ],
            out_specs=pl.BlockSpec((tm, dim), lambda i, j: (i, 0)),
            scratch_shapes=[pltpu.VMEM((tm, dim), jnp.float32)],   # f32 accumulator
        ),
        compiler_params=pltpu.CompilerParams(
            dimension_semantics=("parallel", "arbitrary"),
            vmem_limit_bytes=48 << 20,  # above v5e/v6e scoped defaults, below v7x physical
        ),
    )(xb, w13b, w2b)

    return out[:M].reshape(B, S, dim)


def _reference(x2d, w1, w3, w2):
    h1 = x2d @ w1
    h3 = x2d @ w3
    return (h1 * jax.nn.sigmoid(h1) * h3) @ w2


if __name__ == "__main__":
    # Module hyper-params (synthetic, deterministic init — no checkpoint load).
    dim = 128
    hidden_dim_in = 200
    multiple_of = 64
    hidden_dim = multiple_of * ((hidden_dim_in + multiple_of - 1) // multiple_of)  # -> 256

    batch, seq = 2, 8

    key = jax.random.PRNGKey(0)
    kx, k1, k2, k3 = jax.random.split(key, 4)
    x = jax.random.normal(kx, (batch, seq, dim), dtype=jnp.float32)
    # torch nn.Linear weights are (out, in); we keep them pre-transposed (in, out).
    w1 = jax.random.normal(k1, (dim, hidden_dim), dtype=jnp.float32) * 0.02
    w3 = jax.random.normal(k3, (dim, hidden_dim), dtype=jnp.float32) * 0.02
    w2 = jax.random.normal(k2, (hidden_dim, dim), dtype=jnp.float32) * 0.02

    y = feed_forward(x, w1, w3, w2)
    y = jax.block_until_ready(y)

    # Reference in f32 on the same bf16-quantized operands the kernel feeds the MXU.
    def _bf(a):
        return a.astype(jnp.bfloat16).astype(jnp.float32)

    y_ref = _reference(_bf(x).reshape(-1, dim), _bf(w1), _bf(w3), _bf(w2))
    y_ref = y_ref.reshape(batch, seq, dim)

    assert jnp.allclose(y, y_ref, atol=2e-3, rtol=2e-2), "mismatch vs reference"

    print("KERNEL_OK")
</pallas_src>

<mosaic_0001>
module attributes {stable_mosaic.version = 11 : i64} {
  func.func @_ffn_kernel(%arg0: i32, %arg1: i32, %arg2: memref<16x128xbf16, #tpu.memory_space<vmem>>, %arg3: memref<128x512xbf16, #tpu.memory_space<vmem>>, %arg4: memref<256x128xbf16, #tpu.memory_space<vmem>>, %arg5: memref<16x128xf32, #tpu.memory_space<vmem>>, %arg6: memref<16x128xf32, #tpu.memory_space<vmem>>) attributes {dimension_semantics = [#tpu.dimension_semantics<parallel>, #tpu.dimension_semantics<arbitrary>], iteration_bounds = array<i64: 1, 1>, scalar_prefetch = 0 : i64, scratch_operands = 1 : i64, tpu.core_type = #tpu.core_type<tc>, window_params = [{transform_indices = @transform_0, window_bounds = array<i64: 16, 128>}, {transform_indices = @transform_1, window_bounds = array<i64: 128, 512>}, {transform_indices = @transform_2, window_bounds = array<i64: 256, 128>}, {transform_indices = @transform_3, window_bounds = array<i64: 16, 128>}]} {
    %c0_i32 = arith.constant 0 : i32
    %0 = arith.cmpi eq, %arg1, %c0_i32 : i32
    %1 = arith.extui %0 : i1 to i32
    %c0_i32_0 = arith.constant 0 : i32
    %2 = arith.cmpi ne, %1, %c0_i32_0 : i32
    scf.if %2 {
      %cst_14 = arith.constant 0.000000e+00 : f32
      %24 = vector.broadcast %cst_14 : f32 to vector<16x128xf32>
      %c0_15 = arith.constant 0 : index
      %c0_16 = arith.constant 0 : index
      %25 = vector.load %arg6[%c0_15, %c0_16] : memref<16x128xf32, #tpu.memory_space<vmem>>, vector<16x128xf32>
      tpu.vector_store %arg6[%c0_15, %c0_16], %24 {strides = array<i32>} : memref<16x128xf32, #tpu.memory_space<vmem>>, vector<16x128xf32>,
    } else {
    }
    %c0 = arith.constant 0 : index
    %c0_1 = arith.constant 0 : index
    %3 = vector.load %arg2[%c0, %c0_1] : memref<16x128xbf16, #tpu.memory_space<vmem>>, vector<16x128xbf16>
    %c0_2 = arith.constant 0 : index
    %c0_3 = arith.constant 0 : index
    %4 = vector.load %arg3[%c0_2, %c0_3] : memref<128x512xbf16, #tpu.memory_space<vmem>>, vector<128x512xbf16>
    %cst = arith.constant dense<0.000000e+00> : vector<16x512xf32>
    %5 = tpu.matmul %3, %4, %cst {dimension_numbers = #tpu.dot_dimension_numbers<[1], [0], [0], [1], [0, 0, 1, 1], [], []>} : vector<16x128xbf16>, vector<128x512xbf16>, vector<16x512xf32> -> vector<16x512xf32>
    %6 = vector.extract_strided_slice %5 {offsets = [0, 0], sizes = [16, 256], strides = [1, 1]} : vector<16x512xf32> to vector<16x256xf32>
    %7 = vector.extract_strided_slice %5 {offsets = [0, 256], sizes = [16, 256], strides = [1, 1]} : vector<16x512xf32> to vector<16x256xf32>
    %8 = arith.negf %6 : vector<16x256xf32>
    %9 = math.exp %8 : vector<16x256xf32>
    %cst_4 = arith.constant 1.000000e+00 : f32
    %10 = vector.broadcast %cst_4 : f32 to vector<16x256xf32>
    %11 = arith.addf %10, %9 : vector<16x256xf32>
    %12 = arith.divf %10, %11 : vector<16x256xf32>
    %13 = arith.mulf %6, %12 : vector<16x256xf32>
    %14 = arith.mulf %13, %7 : vector<16x256xf32>
    %c0_5 = arith.constant 0 : index
    %c0_6 = arith.constant 0 : index
    %15 = vector.load %arg6[%c0_5, %c0_6] : memref<16x128xf32, #tpu.memory_space<vmem>>, vector<16x128xf32>
    %16 = arith.truncf %14 : vector<16x256xf32> to vector<16x256xbf16>
    %c0_7 = arith.constant 0 : index
    %c0_8 = arith.constant 0 : index
    %17 = vector.load %arg4[%c0_7, %c0_8] : memref<256x128xbf16, #tpu.memory_space<vmem>>, vector<256x128xbf16>
    %cst_9 = arith.constant dense<0.000000e+00> : vector<16x128xf32>
    %18 = tpu.matmul %16, %17, %cst_9 {dimension_numbers = #tpu.dot_dimension_numbers<[1], [0], [0], [1], [0, 0, 1, 1], [], []>} : vector<16x256xbf16>, vector<256x128xbf16>, vector<16x128xf32> -> vector<16x128xf32>
    %19 = arith.addf %15, %18 : vector<16x128xf32>
    %c0_10 = arith.constant 0 : index
    %c0_11 = arith.constant 0 : index
    %20 = vector.load %arg6[%c0_10, %c0_11] : memref<16x128xf32, #tpu.memory_space<vmem>>, vector<16x128xf32>
    tpu.vector_store %arg6[%c0_10, %c0_11], %19 {strides = array<i32>} : memref<16x128xf32, #tpu.memory_space<vmem>>, vector<16x128xf32>,
    %c0_i32_12 = arith.constant 0 : i32
    %21 = arith.cmpi eq, %arg1, %c0_i32_12 : i32
    %22 = arith.extui %21 : i1 to i32
    %c0_i32_13 = arith.constant 0 : i32
    %23 = arith.cmpi ne, %22, %c0_i32_13 : i32
    scf.if %23 {
      %c0_14 = arith.constant 0 : index
      %c0_15 = arith.constant 0 : index
      %24 = vector.load %arg6[%c0_14, %c0_15] : memref<16x128xf32, #tpu.memory_space<vmem>>, vector<16x128xf32>
      %c0_16 = arith.constant 0 : index
      %c0_17 = arith.constant 0 : index
      %25 = vector.load %arg5[%c0_16, %c0_17] : memref<16x128xf32, #tpu.memory_space<vmem>>, vector<16x128xf32>
      tpu.vector_store %arg5[%c0_16, %c0_17], %24 {strides = array<i32>} : memref<16x128xf32, #tpu.memory_space<vmem>>, vector<16x128xf32>,
    } else {
    }
    return
  }
  func.func @transform_0(%arg0: i32, %arg1: i32) -> (i32, i32) {
    %c0_i32 = arith.constant 0 : i32
    %c0_i32_0 = arith.constant 0 : i32
    return %arg0, %c0_i32 : i32, i32
  }
  func.func @transform_1(%arg0: i32, %arg1: i32) -> (i32, i32) {
    %c0_i32 = arith.constant 0 : i32
    %c0_i32_0 = arith.constant 0 : i32
    return %c0_i32, %arg1 : i32, i32
  }
  func.func @transform_2(%arg0: i32, %arg1: i32) -> (i32, i32) {
    %c0_i32 = arith.constant 0 : i32
    %c0_i32_0 = arith.constant 0 : i32
    return %arg1, %c0_i32 : i32, i32
  }
  func.func @transform_3(%arg0: i32, %arg1: i32) -> (i32, i32) {
    %c0_i32 = arith.constant 0 : i32
    %c0_i32_0 = arith.constant 0 : i32
    return %arg0, %c0_i32 : i32, i32
  }
}

</mosaic_0001>

<bundles_post_ra>
// kernel: tpu_custom_call.1
= control target key start
LH: loop header
LB: loop body
LE: loop exit
PB: predicated region body
PF: predicated region fallthrough
CT: control target
= control target key end

     0   :  { %8 = vsyncpa [#allocation4], 0  ;;  %s923_s0 = inlined_call_operand.hbm [shape: bf16[16,128], index: 0, kind: input, shape index: {}]   ;;  %s924_s1 = inlined_call_operand.hbm [shape: bf16[128,512], index: 1, kind: input, shape index: {}]   ;;  %s925_s2 = inlined_call_operand.hbm [shape: bf16[256,128], index: 2, kind: input, shape index: {}]   ;;  %s926_s3 = inlined_call_operand.hbm [shape: f32[16,128], index: 3, kind: output, shape index: {}]  }
   0x1   :  { %9 = vsyncpa [#allocation7], 0 }
   0x2   :  { %10 = vsyncpa [#allocation5], 0  ;;  %s844_s12 = smov [#allocation6]   ;;  %s750_s16 = scalar_lea.hbm %s924_s1, 4096 }
   0x3   :  { %s28_s13 = sshll.u32 %s844_s12, 4  ;;  %p751_p0 = scmp.ne.s32.totalorder %s924_s1, %s750_s16  ;;  %s29_s13 = int_to_ptr.vmem [resolvable:$true] %s28_s13 }
   0x4   :  { %p754_p1 = scmp.lt.u32.totalorder %s750_s16, %s924_s1 }
   0x6   :  { %p756_p2 = pnand %p754_p1, %p751_p0 }
   0x8   :  { %759 = shalt.err (!%p756_p2)
}
   0x9   :  { %s760_s21 = scalar_lea.vmem %s29_s13, 4096  ;;  %p765_p4 = scmp.lt.s32.totalorder %s29_s13, %s29_s13 }
   0xa   :  { %p761_p3 = scmp.ne.s32.totalorder %s29_s13, %s760_s21  ;;  %p766_p5 = scmp.lt.s32.totalorder %s760_s21, %s760_s21 }
   0xc   :  { %p767_p6 = por %p766_p5, %p765_p4 }
   0xe   :  { %p768_p7 = pnand %p767_p6, %p761_p3 }
  0x10   :  { %771 = shalt.err (!%p768_p7)
}
  0x11   :  { %s845_s22 = smov 256   ;;  %s846_s23 = smov 16  }
  0x12   :  { %34 = dma.hbm_to_vmem [thread:$0]  %s924_s1, 4096, %s29_s13, [#allocation7], %s845_s22, %s845_s22, %s846_s23  }
  0x13   :  { %s847_s26 = smov [#allocation3]   ;;  %s772_s30 = scalar_lea.hbm %s923_s0, 128 }
  0x14   :  { %s16_s27 = sshll.u32 %s847_s26, 4  ;;  %p773_p8 = scmp.ne.s32.totalorder %s923_s0, %s772_s30  ;;  %s17_s27 = int_to_ptr.vmem [resolvable:$true] %s16_s27 }
  0x15   :  { %p776_p9 = scmp.lt.u32.totalorder %s772_s30, %s923_s0 }
  0x17   :  { %p778_p10 = pnand %p776_p9, %p773_p8 }
  0x19   :  { %781 = shalt.err (!%p778_p10)
}
  0x1a   :  { %s782_s8 = scalar_lea.vmem %s17_s27, 128  ;;  %p787_p12 = scmp.lt.s32.totalorder %s17_s27, %s17_s27 }
  0x1b   :  { %p783_p11 = scmp.ne.s32.totalorder %s17_s27, %s782_s8  ;;  %p788_p13 = scmp.lt.s32.totalorder %s782_s8, %s782_s8 }
  0x1d   :  { %p789_p0 = por %p788_p13, %p787_p12 }
  0x1f   :  { %p790_p1 = pnand %p789_p0, %p783_p11 }
  0x21   :  { %793 = shalt.err (!%p790_p1)
}
  0x22   :  { %s848_s1 = smov 64   ;;  %s849_s9 = smov 4  }
  0x23   :  { %22 = dma.hbm_to_vmem [thread:$0]  %s923_s0, 128, %s17_s27, [#allocation4], %s848_s1, %s848_s1, %s849_s9  }
  0x24   :  { %s850_s12 = smov [#allocation8]   ;;  %s794_s16 = scalar_lea.hbm %s925_s2, 2048 }
  0x25   :  { %s40_s13 = sshll.u32 %s850_s12, 4  ;;  %p795_p2 = scmp.ne.s32.totalorder %s925_s2, %s794_s16  ;;  %s41_s13 = int_to_ptr.vmem [resolvable:$true] %s40_s13 }
  0x26   :  { %p798_p3 = scmp.lt.u32.totalorder %s794_s16, %s925_s2 }
  0x28   :  { %p800_p4 = pnand %p798_p3, %p795_p2 }
  0x2a   :  { %803 = shalt.err (!%p800_p4)
}
  0x2b   :  { %s804_s21 = scalar_lea.vmem %s41_s13, 2048  ;;  %p809_p6 = scmp.lt.s32.totalorder %s41_s13, %s41_s13 }
  0x2c   :  { %p805_p5 = scmp.ne.s32.totalorder %s41_s13, %s804_s21  ;;  %p810_p7 = scmp.lt.s32.totalorder %s804_s21, %s804_s21 }
  0x2e   :  { %p811_p8 = por %p810_p7, %p809_p6 }
  0x30   :  { %p812_p9 = pnand %p811_p8, %p805_p5 }
  0x32   :  { %815 = shalt.err (!%p812_p9)
}
  0x33   :  { %46 = dma.hbm_to_vmem [thread:$0]  %s925_s2, 2048, %s41_s13, [#allocation7], %s848_s1, %s848_s1, %s849_s9  }
  0x34   :  { %838 = dma.done.wait [#allocation4], 128  }
  0x35   :  { %839 = vsyncadd [#allocation4], 4294967168 }
  0x36   :  { %840 = dma.done.wait [#allocation7], 6144  }
  0x37   :  { %841 = vsyncadd [#allocation7], 4294961152  ;;  %v851_v0 = vmov 0   ;;  %v669_v1 = vld [vmem:[#allocation6 + $0x4] ss:$16 sps:$4 sm:$0xff]   ;;  %v699_v29 = vld [vmem:[#allocation3] sm:$0xff]  }
  0x38   :  { %295 = vmatprep.mubr.bf16.mxu0 %v851_v0  ;;  %338 = vmatprep.mubr.bf16.mxu1 %v851_v0  ;;  %v671_v2 = vld [vmem:[#allocation6] ss:$16 sps:$4 sm:$0xff]   ;;  %v672_v3 = vld [vmem:[#allocation6 + $0x24] ss:$16 sps:$4 sm:$0xff]   ;;  %v690_v8 = vld [vmem:[#allocation6 + $0xc] ss:$16 sps:$4 sm:$0xff]  }
  0x39   :  { %263 = vmatprep.subr.bf16.mxu0 %v669_v1  ;;  %v674_v4 = vld [vmem:[#allocation6 + $0x20] ss:$16 sps:$4 sm:$0xff]   ;;  %v675_v5 = vld [vmem:[#allocation6 + $0x44] ss:$16 sps:$4 sm:$0xff]   ;;  %v692_v9 = vld [vmem:[#allocation6 + $0x8] ss:$16 sps:$4 sm:$0xff]   ;;  %306 = vmatprep.subr.bf16.mxu1 %v690_v8 }
  0x3a   :  { %264 = vmatpush1.bf16.msra.mxu0 %v671_v2  ;;  %v677_v6 = vld [vmem:[#allocation6 + $0x40] ss:$16 sps:$4 sm:$0xff]   ;;  %v678_v7 = vld [vmem:[#allocation6 + $0x64] ss:$16 sps:$4 sm:$0xff]   ;;  %v696_v12 = vld [vmem:[#allocation6 + $0x2c] ss:$16 sps:$4 sm:$0xff]   ;;  %307 = vmatpush1.bf16.msra.mxu1 %v692_v9 }
  0x3b   :  { %265 = vmatprep.subr.bf16.mxu0 %v672_v3  ;;  %v680_v10 = vld [vmem:[#allocation6 + $0x60] ss:$16 sps:$4 sm:$0xff]   ;;  %v681_v11 = vld [vmem:[#allocation6 + $0x84] ss:$16 sps:$4 sm:$0xff]   ;;  %v698_v13 = vld [vmem:[#allocation6 + $0x28] ss:$16 sps:$4 sm:$0xff]   ;;  %308 = vmatprep.subr.bf16.mxu1 %v696_v12 }
  0x3c   :  { %v683_v14 = vld [vmem:[#allocation6 + $0x80] ss:$16 sps:$4 sm:$0xff]   ;;  %v700_v15 = vld [vmem:[#allocation6 + $0x4c] ss:$16 sps:$4 sm:$0xff]   ;;  %v684_v16 = vld [vmem:[#allocation6 + $0xa4] ss:$16 sps:$4 sm:$0xff]  }
  0x3d   :  { %v702_v17 = vld [vmem:[#allocation6 + $0x48] ss:$16 sps:$4 sm:$0xff]   ;;  %v703_v18 = vld [vmem:[#allocation6 + $0x6c] ss:$16 sps:$4 sm:$0xff]   ;;  %v686_v19 = vld [vmem:[#allocation6 + $0xa0] ss:$16 sps:$4 sm:$0xff]  }
  0x3e   :  { %266 = vmatpush1.bf16.msra.mxu0 %v674_v4  ;;  %309 = vmatpush1.bf16.msra.mxu1 %v698_v13  ;;  %v687_v20 = vld [vmem:[#allocation6 + $0xc4] ss:$16 sps:$4 sm:$0xff]   ;;  %v689_v21 = vld [vmem:[#allocation6 + $0xc0] ss:$16 sps:$4 sm:$0xff]   ;;  %v705_v22 = vld [vmem:[#allocation6 + $0x68] ss:$16 sps:$4 sm:$0xff]  }
  0x3f   :  { %267 = vmatprep.subr.bf16.mxu0 %v675_v5  ;;  %310 = vmatprep.subr.bf16.mxu1 %v700_v15  ;;  %v693_v23 = vld [vmem:[#allocation6 + $0xe4] ss:$16 sps:$4 sm:$0xff]   ;;  %v706_v24 = vld [vmem:[#allocation6 + $0x8c] ss:$16 sps:$4 sm:$0xff]   ;;  %v708_v25 = vld [vmem:[#allocation6 + $0x88] ss:$16 sps:$4 sm:$0xff]  }
  0x40   :  { %v709_v26 = vld [vmem:[#allocation6 + $0xac] ss:$16 sps:$4 sm:$0xff]   ;;  %v695_v27 = vld [vmem:[#allocation6 + $0xe0] ss:$16 sps:$4 sm:$0xff]   ;;  %v711_v28 = vld [vmem:[#allocation6 + $0xa8] ss:$16 sps:$4 sm:$0xff]  }
  0x41   :  { %v712_v30 = vld [vmem:[#allocation6 + $0xcc] ss:$16 sps:$4 sm:$0xff]   ;;  %v714_v31 = vld [vmem:[#allocation6 + $0xc8] ss:$16 sps:$4 sm:$0xff]   ;;  %v718_v34 = vld [vmem:[#allocation8 + $0x40] sm:$0xff]   ;;  %s852_s2 = smov [#allocation9]  }
  0x42   :  { %268 = vmatpush1.bf16.msra.mxu0 %v677_v6  ;;  %311 = vmatpush1.bf16.msra.mxu1 %v702_v17  ;;  %v715_v32 = vld [vmem:[#allocation6 + $0xec] ss:$16 sps:$4 sm:$0xff]   ;;  %v717_v33 = vld [vmem:[#allocation6 + $0xe8] ss:$16 sps:$4 sm:$0xff]   ;;  %v719_v35 = vld [vmem:[#allocation8] sm:$0xff]   ;;  %s570_s23 = sshll.u32 %s852_s2, 4  ;;  %s571_s23 = int_to_ptr.vmem [resolvable:$true] %s570_s23 }
  0x43   :  { %269 = vmatprep.subr.bf16.mxu0 %v678_v7  ;;  %312 = vmatprep.subr.bf16.mxu1 %v703_v18  ;;  %v720_v36 = vld [vmem:[#allocation8 + $0x48] sm:$0xff]   ;;  %v722_v38 = vld [vmem:[#allocation8 + $0x50] sm:$0xff]   ;;  %v724_v40 = vld [vmem:[#allocation8 + $0x58] sm:$0xff]   ;;  %s816_s24 = scalar_lea.vmem %s571_s23, 256  ;;  %p821_p11 = scmp.lt.s32.totalorder %s571_s23, %s571_s23 }
  0x44   :  { %v721_v37 = vld [vmem:[#allocation8 + $0x8] sm:$0xff]   ;;  %v723_v39 = vld [vmem:[#allocation8 + $0x10] sm:$0xff]   ;;  %v725_v41 = vld [vmem:[#allocation8 + $0x18] sm:$0xff]   ;;  %p817_p10 = scmp.ne.s32.totalorder %s571_s23, %s816_s24  ;;  %p822_p12 = scmp.lt.s32.totalorder %s816_s24, %s816_s24 }
  0x45   :  { %v726_v42 = vld [vmem:[#allocation8 + $0x60] sm:$0xff]   ;;  %v728_v44 = vld [vmem:[#allocation8 + $0x68] sm:$0xff]   ;;  %v730_v46 = vld [vmem:[#allocation8 + $0x70] sm:$0xff]  }
  0x46   :  { %270 = vmatpush1.bf16.msra.mxu0 %v680_v10  ;;  %313 = vmatpush1.bf16.msra.mxu1 %v705_v22  ;;  %v727_v43 = vld [vmem:[#allocation8 + $0x20] sm:$0xff]   ;;  %v729_v45 = vld [vmem:[#allocation8 + $0x28] sm:$0xff]   ;;  %v731_v47 = vld [vmem:[#allocation8 + $0x30] sm:$0xff]   ;;  %p823_p13 = por %p822_p12, %p821_p11 }
  0x47   :  { %271 = vmatprep.subr.bf16.mxu0 %v681_v11  ;;  %314 = vmatprep.subr.bf16.mxu1 %v706_v24  ;;  %v732_v48 = vld [vmem:[#allocation8 + $0x78] sm:$0xff]  }
  0x48   :  { %v733_v49 = vld [vmem:[#allocation8 + $0x38] sm:$0xff]   ;;  %p824_p0 = pnand %p823_p13, %p817_p10 }
  0x4a   :  { %272 = vmatpush1.bf16.msra.mxu0 %v683_v14  ;;  %315 = vmatpush1.bf16.msra.mxu1 %v708_v25 }
  0x4b   :  { %273 = vmatprep.subr.bf16.mxu0 %v684_v16  ;;  %316 = vmatprep.subr.bf16.mxu1 %v709_v26 }
  0x4e   :  { %274 = vmatpush1.bf16.msra.mxu0 %v686_v19  ;;  %317 = vmatpush1.bf16.msra.mxu1 %v711_v28 }
  0x4f   :  { %275 = vmatprep.subr.bf16.mxu0 %v687_v20  ;;  %318 = vmatprep.subr.bf16.mxu1 %v712_v30 }
  0x52   :  { %276 = vmatpush1.bf16.msra.mxu0 %v689_v21  ;;  %319 = vmatpush1.bf16.msra.mxu1 %v714_v31 }
  0x53   :  { %277 = vmatprep.subr.bf16.mxu0 %v693_v23  ;;  %320 = vmatprep.subr.bf16.mxu1 %v715_v32 }
  0x56   :  { %278 = vmatpush1.bf16.msra.mxu0 %v695_v27  ;;  %321 = vmatpush1.bf16.msra.mxu1 %v717_v33 }
  0x57   :  { %636 = vmatprep.subr.bf16.mxu0 %v718_v34 }
  0x59   :  { %296 = vmatmul.mubr.bf16.vlgmr.msra.gmra.mrb[0].mxu0 %v699_v29  ;;  %339 = vmatmul.mubr.bf16.vlgmr.msra.gmra.mrb[0].mxu1 %v699_v29 }
  0x5a   :  { %637 = vmatpush3.bf16.msra.mxu0 %v719_v35 }
  0x5b   :  { %638 = vmatprep.subr.bf16.mxu0 %v720_v36 }
  0x5e   :  { %639 = vmatpush3.bf16.msra.mxu0 %v721_v37 }
  0x5f   :  { %640 = vmatprep.subr.bf16.mxu0 %v722_v38 }
  0x62   :  { %641 = vmatpush3.bf16.msra.mxu0 %v723_v39 }
  0x63   :  { %642 = vmatprep.subr.bf16.mxu0 %v724_v40 }
  0x66   :  { %643 = vmatpush3.bf16.msra.mxu0 %v725_v41 }
  0x67   :  { %644 = vmatprep.subr.bf16.mxu0 %v726_v42 }
  0x6a   :  { %645 = vmatpush3.bf16.msra.mxu0 %v727_v43 }
  0x6b   :  { %646 = vmatprep.subr.bf16.mxu0 %v728_v44 }
  0x6e   :  { %647 = vmatpush3.bf16.msra.mxu0 %v729_v45 }
  0x6f   :  { %648 = vmatprep.subr.bf16.mxu0 %v730_v46 }
  0x72   :  { %649 = vmatpush3.bf16.msra.mxu0 %v731_v47 }
  0x73   :  { %650 = vmatprep.subr.bf16.mxu0 %v732_v48 }
  0x76   :  { %651 = vmatpush3.bf16.msra.mxu0 %v733_v49 }
 0x12c   :  { %v297_v50 = vpop.f32.mrb[0].mxu0  ;;  %v340_v58 = vpop.f32.mrb[0].mxu1 }
 0x12d   :  { %v616_v51 = vmul.f32 -1.442695, %v297_v50  ;;  %v299_v52 = vpop.f32.mrb[1].mxu0  ;;  %v342_v59 = vpop.f32.mrb[1].mxu1 }
 0x12e   :  { %v617_v53 = vmul.f32 -1.442695, %v299_v52  ;;  %v301_v54 = vpop.f32.mrb[2].mxu0  ;;  %v344_v60 = vpop.f32.mrb[2].mxu1 }
 0x12f   :  { %734 = vpow2.f32 %v616_v51  ;;  %v618_v55 = vmul.f32 -1.442695, %v301_v54  ;;  %v303_v56 = vpop.f32.mrb[3].mxu0  ;;  %v346_v62 = vpop.f32.mrb[3].mxu1 }
 0x130   :  { %736 = vpow2.f32 %v617_v53  ;;  %v619_v57 = vmul.f32 -1.442695, %v303_v56 }
 0x131   :  { %738 = vpow2.f32 %v618_v55 }
 0x132   :  { %740 = vpow2.f32 %v619_v57 }
 0x139   :  { %v735_v61 = vpop.eup %734 }
 0x13a   :  { %v737_v63 = vpop.eup %736  ;;  %v361_v0 = vadd.f32 1.0, %v735_v61 }
 0x13b   :  { %v739_v1 = vpop.eup %738  ;;  %v362_v2 = vadd.f32 1.0, %v737_v63 }
 0x13c   :  { %v741_v3 = vpop.eup %740  ;;  %742 = vrcp.f32 %v361_v0  ;;  %v363_v4 = vadd.f32 1.0, %v739_v1 }
 0x13d   :  { %744 = vrcp.f32 %v362_v2  ;;  %v364_v5 = vadd.f32 1.0, %v741_v3 }
 0x13e   :  { %746 = vrcp.f32 %v363_v4 }
 0x13f   :  { %748 = vrcp.f32 %v364_v5 }
 0x146   :  { %v743_v6 = vpop.eup %742 }
 0x147   :  { %v745_v7 = vpop.eup %744  ;;  %v373_v8 = vmul.f32 %v743_v6, %v297_v50 }
 0x148   :  { %v747_v9 = vpop.eup %746  ;;  %v374_v10 = vmul.f32 %v745_v7, %v299_v52 }
 0x149   :  { %v749_v11 = vpop.eup %748  ;;  %v375_v12 = vmul.f32 %v747_v9, %v301_v54  ;;  %v377_v13 = vmul.f32 %v373_v8, %v340_v58 }
 0x14a   :  { %v376_v14 = vmul.f32 %v749_v11, %v303_v56  ;;  %v378_v15 = vmul.f32 %v374_v10, %v342_v59 }
 0x14b   :  { %v379_v16 = vmul.f32 %v375_v12, %v344_v60 }
 0x14c   :  { %v380_v17 = vmul.f32 %v376_v14, %v346_v62 }
 0x14d   :  { %v383_v18 = vpack.c.bf16 %v379_v16, %v377_v13 }
 0x14e   :  { %v384_v19 = vpack.c.bf16 %v380_v17, %v378_v15 }
 0x150   :  { %545 = vmatprep.mubr.bf16.mxu0 %v384_v19 }
 0x151   :  { %546 = vmatmul.mubr.bf16.vlgmr.msra.gmra.mrb[4].mxu0 %v383_v18 }
 0x224   :  { %v652_v20 = vpop.f32.mrb[4].mxu0 }
 0x225   :  { %v653_v21 = vpop.f32.mrb[5].mxu0 }
 0x226   :  { %v654_v22 = vadd.f32 %v653_v21, %v652_v20  ;;  %v655_v23 = vpop.f32.mrb[6].mxu0 }
 0x227   :  { %v656_v24 = vpop.f32.mrb[7].mxu0 }
 0x228   :  { %563 = vst [vmem:[#allocation9] sm:$0xff] %v654_v22  ;;  %v657_v25 = vadd.f32 %v656_v24, %v655_v23 }
 0x22a   :  { %564 = vst [vmem:[#allocation9 + $0x8] sm:$0xff] %v657_v25 }
 0x22b   :  { %827 = shalt.err (!%p824_p0)
}
 0x22c   :  { %s828_s27 = scalar_lea.hbm %s926_s3, 256 }
 0x22d   :  { %p829_p1 = scmp.ne.s32.totalorder %s926_s3, %s828_s27  ;;  %p832_p2 = scmp.lt.u32.totalorder %s828_s27, %s926_s3 }
 0x22f   :  { %p834_p3 = pnand %p832_p2, %p829_p1 }
 0x231   :  { %837 = shalt.err (!%p834_p3)
}
 0x232   :  { %s853_s5 = smov 128   ;;  %s854_s6 = smov 8  }
 0x233   :  { %576 = dma.vmem_to_hbm [thread:$0]  %s571_s23, 256, %s926_s3, [#allocation5], %s853_s5, %s853_s5, %s854_s6  }
 0x234   :  { %842 = dma.done.wait [#allocation5], 256  }
 0x235   :  { %843 = vsyncadd [#allocation5], 4294967040 }
 0x236   :  { %580 = vsyncpa [#allocation4], 1 }
 0x237   :  { %581 = vsyncpa [#allocation7], 1 }
 0x238   :  { %582 = vsyncpa [#allocation5], 1 }

</bundles_post_ra>
